<compile_context>
chip_gen: v5e
topology: v5e:2x2
jax: 0.10.0
libtpu: 0.0.40
codegen_flags: <defaults>
</compile_context>

<pallas_src>
import jax
import jax.numpy as jnp
from jax import lax
from jax.experimental import pallas as pl
from jax.experimental.pallas import tpu as pltpu


def _round_up(x, m):
    return (x + m - 1) // m * m


def _choose_row_tile(num_rows, vocab, itemsize):
    """Row tile sized to ~4 MiB of native-dtype logits per block.

    Uses the lane-padded vocab width (VMEM pads the last dim to 128 lanes) so
    the estimate reflects real VMEM footprint.  With 2-deep double buffering
    of the input plus ~2-3 full-tile f32 temporaries this stays under the
    48 MiB vmem limit set below (safe on v7x's 64 MiB physical VMEM)."""
    padded_v = _round_up(max(vocab, 1), 128)
    budget_bytes = 4 << 20
    tm = budget_bytes // max(padded_v * itemsize, 1)
    tm = max(8, min(4096, (tm // 8) * 8))
    # No point making the tile larger than the (8-rounded) number of rows.
    tm = min(tm, _round_up(num_rows, 8))
    # Keep at least two row tiles so v7x's two TensorCores both get work.
    if num_rows > 8:
        half = max(8, _round_up(-(-num_rows // 2), 8))
        tm = min(tm, half)
    return tm


def _make_masked_ce_kernel(num_rows):
    def kernel(vocab_ref, logits_ref, target_ref, partial_ref):
        tm, v = logits_ref.shape

        x = logits_ref[...]                                 # (TM, V) native dtype
        tgt = target_ref[...]                               # (TM, 1) i32, -1 = masked

        # Row max in the native dtype (exact for bf16; padded lanes masked by
        # Mosaic with the reduction identity).
        m = jnp.max(x, axis=-1, keepdims=True)              # (TM, 1)

        # One-hot gather of the target-class logit: resident lane-index row
        # broadcast-compared against the per-row targets.  tgt == -1 never
        # matches any lane, so masked rows get x_tgt = 0 (finite, zeroed by w).
        eq = vocab_ref[...] == tgt                           # (TM, V) bool
        x_tgt = jnp.sum(jnp.where(eq, x, jnp.zeros_like(x)),
                        axis=-1, keepdims=True).astype(jnp.float32)  # exact: one-hot

        # exp / log-sum-exp arithmetic in f32 (the subtraction feeding exp and
        # the final log must be f32; max/compare/select above are exact).
        m32 = m.astype(jnp.float32)
        sumexp = jnp.sum(jnp.exp(x.astype(jnp.float32) - m32),
                         axis=-1, keepdims=True)             # (TM, 1)

        nll = (m32 + jnp.log(sumexp)) - x_tgt                # (TM, 1)

        # (t < length) mask recovered from the -1 encoding.
        w = (tgt >= 0).astype(jnp.float32)                   # (TM, 1)

        # Rows past num_rows are block padding (undefined VMEM contents):
        # SELECT them to exactly 0 (a multiply-by-mask would propagate NaN).
        row_ids = pl.program_id(0) * tm + lax.broadcasted_iota(
            jnp.int32, (tm, 1), 0)
        contrib = jnp.where(row_ids < num_rows, nll * w, 0.0)

        # Lane-dense (8,128) store of the per-tile partial sum (unmasked vst);
        # the wrapper reads element [0,0] of each tile's slab and reduces.
        partial = jnp.sum(contrib, keepdims=True)             # (1, 1)
        partial_ref[...] = jnp.broadcast_to(partial, (8, 128))

    return kernel


def masked_cross_entropy(output_prob, target_label, target_lengths, *,
                         row_tile=None):
    """output_prob: (B, T, V) float logits (any float dtype, e.g. bf16/f32);
    target_label: (B, T) int class indices; target_lengths: (B,) int.
    Returns the scalar f32 masked cross-entropy (sum NLL / sum lengths)."""
    B, T, V = output_prob.shape
    num_rows = B * T

    logits = output_prob.reshape(num_rows, V)      # native dtype, no HBM f32 copy
    lengths = jnp.asarray(target_lengths, jnp.int32)

    # Fold the (t < length) mask into the targets: masked positions become -1,
    # which never matches a vocab lane.  This removes a separate per-row
    # weights input stream.  (Valid class ids are assumed non-negative.)
    # TODO(synk): building the mask in-kernel from SMEM lengths would need a
    # vector gather lengths[row // T], which has no clean Pallas/Mosaic form.
    t_ids = jnp.arange(T, dtype=jnp.int32)[None, :]
    valid = t_ids < lengths[:, None]                                   # (B, T)
    targets = jnp.where(valid, jnp.asarray(target_label, jnp.int32), -1)
    targets = targets.reshape(num_rows, 1)

    # Resident lane-index row (replaces a per-grid-step (TM, V) iota).
    vocab_row = jnp.arange(V, dtype=jnp.int32)[None, :]                # (1, V)

    itemsize = jnp.dtype(logits.dtype).itemsize
    tm = row_tile if row_tile is not None else _choose_row_tile(
        num_rows, V, itemsize)
    tm = max(8, _round_up(int(tm), 8))
    num_tiles = pl.cdiv(num_rows, tm)

    cost = pl.CostEstimate(
        flops=5 * num_rows * V,
        transcendentals=num_rows * V + num_rows,
        bytes_accessed=num_rows * V * itemsize + num_rows * 4 + V * 4
        + num_tiles * 8 * 128 * 4,
    )

    partials = pl.pallas_call(
        _make_masked_ce_kernel(num_rows),
        out_shape=jax.ShapeDtypeStruct((num_tiles * 8, 128), jnp.float32),
        grid=(num_tiles,),
        in_specs=[
            pl.BlockSpec((1, V), lambda i: (0, 0)),    # resident vocab lane ids
            pl.BlockSpec((tm, V), lambda i: (i, 0)),   # logits row tile (native)
            pl.BlockSpec((tm, 1), lambda i: (i, 0)),   # targets (mask folded in)
        ],
        out_specs=pl.BlockSpec((8, 128), lambda i: (i, 0)),
        compiler_params=pltpu.CompilerParams(
            dimension_semantics=("parallel",),
            vmem_limit_bytes=48 * 1024 * 1024,
        ),
        cost_estimate=cost,
    )(vocab_row, logits, targets)

    loss_sum = jnp.sum(partials.reshape(num_tiles, 8 * 128)[:, 0])
    return loss_sum / jnp.sum(lengths.astype(jnp.float32))


def get_loss_forward(output_prob, target_label, target_lengths):
    # Mirrors get_loss.forward (the module itself has no parameters).
    return masked_cross_entropy(output_prob, target_label, target_lengths)


def _reference_loss(logits, target, lengths):
    # Pure-JAX reference of the PyTorch masked_cross_entropy, for validation.
    logp = jax.nn.log_softmax(logits.astype(jnp.float32), axis=-1)
    nll = -jnp.take_along_axis(logp, target[..., None], axis=-1)[..., 0]
    t_ids = jnp.arange(logits.shape[1])[None, :]
    mask = (t_ids < lengths[:, None]).astype(jnp.float32)
    return jnp.sum(nll * mask) / jnp.sum(lengths.astype(jnp.float32))


if __name__ == "__main__":
    key = jax.random.PRNGKey(0)
    k1, k2, k3, k4, k5, k6, k7, k8, k9 = jax.random.split(key, 9)

    # Case 1: small SC-LSTM-like shapes, f32 logits (batch=2, seq=8, vocab=32).
    B, T, V = 2, 8, 32
    output_prob = jax.random.normal(k1, (B, T, V), jnp.float32)
    target_label = jax.random.randint(k2, (B, T), 0, V, jnp.int32)
    target_lengths = jax.random.randint(k3, (B,), 1, T + 1, jnp.int32)

    loss = get_loss_forward(output_prob, target_label, target_lengths)
    jax.block_until_ready(loss)
    ref = _reference_loss(output_prob, target_label, target_lengths)
    assert jnp.allclose(loss, ref, rtol=1e-5, atol=1e-5), (loss, ref)

    # Case 2: bf16 logits, vocab not a multiple of 128, forced small row tile
    # so the grid has several (partially filled) tiles.
    B2, T2, V2 = 3, 10, 50
    logits2 = jax.random.normal(k4, (B2, T2, V2), jnp.float32).astype(jnp.bfloat16)
    targets2 = jax.random.randint(k5, (B2, T2), 0, V2, jnp.int32)
    lengths2 = jax.random.randint(k6, (B2,), 1, T2 + 1, jnp.int32)

    loss2 = masked_cross_entropy(logits2, targets2, lengths2, row_tile=8)
    jax.block_until_ready(loss2)
    ref2 = _reference_loss(logits2, targets2, lengths2)
    assert jnp.allclose(loss2, ref2, rtol=1e-4, atol=1e-4), (loss2, ref2)

    # Case 3: all-negative logits with an awkward vocab (V=130) to confirm
    # padded lanes are masked with the reduction identity (a zero-filled pad
    # would corrupt both the row max and the sum(exp)).
    B3, T3, V3 = 2, 9, 130
    logits3 = -(jnp.abs(jax.random.normal(k7, (B3, T3, V3), jnp.float32)) + 1.0)
    targets3 = jax.random.randint(k8, (B3, T3), 0, V3, jnp.int32)
    lengths3 = jax.random.randint(k9, (B3,), 1, T3 + 1, jnp.int32)

    loss3 = get_loss_forward(logits3, targets3, lengths3)
    jax.block_until_ready(loss3)
    ref3 = _reference_loss(logits3, targets3, lengths3)
    assert jnp.allclose(loss3, ref3, rtol=1e-5, atol=1e-5), (loss3, ref3)

    print("KERNEL_OK")
</pallas_src>

<mosaic_0001>
module attributes {stable_mosaic.version = 11 : i64} {
  func.func @kernel(%arg0: i32, %arg1: memref<1x32xi32, #tpu.memory_space<vmem>>, %arg2: memref<8x32xf32, #tpu.memory_space<vmem>>, %arg3: memref<8x1xi32, #tpu.memory_space<vmem>>, %arg4: memref<8x128xf32, #tpu.memory_space<vmem>>) attributes {dimension_semantics = [#tpu.dimension_semantics<parallel>], iteration_bounds = array<i64: 2>, scalar_prefetch = 0 : i64, scratch_operands = 0 : i64, tpu.core_type = #tpu.core_type<tc>, window_params = [{pipeline_mode = #tpu.pipeline_mode<synchronous>, transform_indices = @transform_0, window_bounds = array<i64: 1, 32>}, {transform_indices = @transform_1, window_bounds = array<i64: 8, 32>}, {transform_indices = @transform_2, window_bounds = array<i64: 8, 1>}, {transform_indices = @transform_3, window_bounds = array<i64: 8, 128>}]} {
    %c0 = arith.constant 0 : index
    %c0_0 = arith.constant 0 : index
    %0 = vector.load %arg2[%c0, %c0_0] : memref<8x32xf32, #tpu.memory_space<vmem>>, vector<8x32xf32>
    %c0_1 = arith.constant 0 : index
    %c0_2 = arith.constant 0 : index
    %1 = vector.load %arg3[%c0_1, %c0_2] : memref<8x1xi32, #tpu.memory_space<vmem>>, vector<8x1xi32>
    %cst = arith.constant dense<0xFF800000> : vector<8xf32>
    %2 = vector.multi_reduction <maximumf>, %0, %cst [1] : vector<8x32xf32> to vector<8xf32>
    %3 = vector.shape_cast %2 : vector<8xf32> to vector<8x1xf32>
    %c0_3 = arith.constant 0 : index
    %c0_4 = arith.constant 0 : index
    %4 = vector.load %arg1[%c0_3, %c0_4] : memref<1x32xi32, #tpu.memory_space<vmem>>, vector<1x32xi32>
    %5 = vector.broadcast %4 : vector<1x32xi32> to vector<8x32xi32>
    %6 = vector.broadcast %1 : vector<8x1xi32> to vector<8x32xi32>
    %7 = arith.cmpi eq, %5, %6 : vector<8x32xi32>
    %cst_5 = arith.constant 0.000000e+00 : f32
    %8 = vector.broadcast %cst_5 : f32 to vector<8x32xf32>
    %9 = arith.select %7, %0, %8 : vector<8x32xi1>, vector<8x32xf32>
    %cst_6 = arith.constant dense<0.000000e+00> : vector<8xf32>
    %10 = vector.multi_reduction <add>, %9, %cst_6 [1] : vector<8x32xf32> to vector<8xf32>
    %11 = vector.shape_cast %10 : vector<8xf32> to vector<8x1xf32>
    %12 = vector.broadcast %3 : vector<8x1xf32> to vector<8x32xf32>
    %13 = arith.subf %0, %12 : vector<8x32xf32>
    %14 = math.exp %13 : vector<8x32xf32>
    %cst_7 = arith.constant dense<0.000000e+00> : vector<8xf32>
    %15 = vector.multi_reduction <add>, %14, %cst_7 [1] : vector<8x32xf32> to vector<8xf32>
    %16 = vector.shape_cast %15 : vector<8xf32> to vector<8x1xf32>
    %17 = math.log %16 : vector<8x1xf32>
    %18 = arith.addf %3, %17 : vector<8x1xf32>
    %19 = arith.subf %18, %11 : vector<8x1xf32>
    %c0_i32 = arith.constant 0 : i32
    %20 = vector.broadcast %c0_i32 : i32 to vector<8x1xi32>
    %21 = arith.cmpi sge, %1, %20 : vector<8x1xi32>
    %22 = arith.extui %21 : vector<8x1xi1> to vector<8x1xi32>
    %23 = arith.sitofp %22 : vector<8x1xi32> to vector<8x1xf32>
    %c8_i32 = arith.constant 8 : i32
    %24 = arith.muli %arg0, %c8_i32 : i32
    %25 = tpu.iota {dimensions = array<i32: 0>} : vector<8x1xi32>
    %26 = vector.broadcast %24 : i32 to vector<8x1xi32>
    %27 = arith.addi %26, %25 : vector<8x1xi32>
    %c16_i32 = arith.constant 16 : i32
    %28 = vector.broadcast %c16_i32 : i32 to vector<8x1xi32>
    %29 = arith.cmpi slt, %27, %28 : vector<8x1xi32>
    %30 = arith.mulf %19, %23 : vector<8x1xf32>
    %cst_8 = arith.constant 0.000000e+00 : f32
    %31 = vector.broadcast %cst_8 : f32 to vector<8x1xf32>
    %32 = arith.select %29, %30, %31 : vector<8x1xi1>, vector<8x1xf32>
    %33 = vector.shape_cast %32 : vector<8x1xf32> to vector<1x8x1xf32>
    %cst_9 = arith.constant dense<0.000000e+00> : vector<1xf32>
    %34 = vector.multi_reduction <add>, %33, %cst_9 [1, 2] : vector<1x8x1xf32> to vector<1xf32>
    %35 = vector.shape_cast %34 : vector<1xf32> to vector<1x1x1xf32>
    %36 = vector.extract %35[0, 0, 0] : f32 from vector<1x1x1xf32>
    %37 = vector.broadcast %36 : f32 to vector<1x1xf32>
    %38 = vector.shape_cast %37 : vector<1x1xf32> to vector<1x1xf32>
    %39 = vector.broadcast %38 : vector<1x1xf32> to vector<8x128xf32>
    %c0_10 = arith.constant 0 : index
    %c0_11 = arith.constant 0 : index
    %40 = vector.load %arg4[%c0_10, %c0_11] : memref<8x128xf32, #tpu.memory_space<vmem>>, vector<8x128xf32>
    tpu.vector_store %arg4[%c0_10, %c0_11], %39 {strides = array<i32>} : memref<8x128xf32, #tpu.memory_space<vmem>>, vector<8x128xf32>,
    return
  }
  func.func @transform_0(%arg0: i32) -> (i32, i32) {
    %c0_i32 = arith.constant 0 : i32
    %c0_i32_0 = arith.constant 0 : i32
    %c0_i32_1 = arith.constant 0 : i32
    return %c0_i32, %c0_i32_0 : i32, i32
  }
  func.func @transform_1(%arg0: i32) -> (i32, i32) {
    %c0_i32 = arith.constant 0 : i32
    %c0_i32_0 = arith.constant 0 : i32
    return %arg0, %c0_i32 : i32, i32
  }
  func.func @transform_2(%arg0: i32) -> (i32, i32) {
    %c0_i32 = arith.constant 0 : i32
    %c0_i32_0 = arith.constant 0 : i32
    return %arg0, %c0_i32 : i32, i32
  }
  func.func @transform_3(%arg0: i32) -> (i32, i32) {
    %c0_i32 = arith.constant 0 : i32
    %c0_i32_0 = arith.constant 0 : i32
    return %arg0, %c0_i32 : i32, i32
  }
}

</mosaic_0001>

<bundles_post_ra>
// kernel: tpu_custom_call.1
= control target key start
LH: loop header
LB: loop body
LE: loop exit
PB: predicated region body
PF: predicated region fallthrough
CT: control target
= control target key end

     0   :  { %8 = vsyncpa [#allocation3], 0  ;;  %s562_s0 = inlined_call_operand.vmem [shape: s32[1,32], index: 0, kind: input, shape index: {}]   ;;  %s563_s1 = inlined_call_operand.vmem [shape: f32[16,32], index: 1, kind: input, shape index: {}]   ;;  %s564_s2 = inlined_call_operand.vmem [shape: s32[16,1], index: 2, kind: input, shape index: {}]   ;;  %s565_s3 = inlined_call_operand.hbm [shape: f32[16,128], index: 3, kind: output, shape index: {}]  }
   0x1   :  { %10 = vsyncpa [#allocation3 + $0x1], 0  ;;  %s468_s12 = smov 0   ;;  %s470_s13 = smov 0  }
   0x2   :  { %s472_s14 = smov 0   ;;  %s474_s15 = smov 0  }
   0x3 LB: > { %s489_s16 = sadd.s32 4294967295, %s444_s15   ;;  %s320_s17 = sadd.s32 4294967294, %s444_s15   ;;  %s444_s15 = sphi %s474_s15, %s571_s15   ;;  %s440_s14 = sphi %s472_s14, %s570_s14   ;;  %s436_s13 = sphi %s470_s13, %s569_s13   ;;  %s432_s12 = sphi %s468_s12, %s568_s12  }
   0x4   : > { %s493_s18 = sadd.s32 1, %s444_s15   ;;  %s96_s19 = sadd.s32 1, %s440_s14 }
   0x5   : > { %s93_s20 = ssub.s32 %s444_s15, %s493_s18  ;;  %p106_p0 = scmp.ne.s32.totalorder %s440_s14, %s436_s13 }
   0x6   : > { %p94_p1 = scmp.eq.s32.totalorder %s93_s20, 0  ;;  %p107_p2 = scmp.eq.s32.totalorder %s489_s16, 1 }
   0x7   : > { %p112_p3 = scmp.ne.s32.totalorder %s436_s13, %s432_s12  ;;  %p113_p4 = scmp.eq.s32.totalorder %s320_s17, 1 }
   0x8   : > { %s504_s21 = scalar_select %p94_p1, %s440_s14, %s96_s19  }
   0x9   : > { %p506_p5 = por %p107_p2, %p106_p0  ;;  %p510_p6 = por %p113_p4, %p112_p3 }
   0xa   : > { %p323_p7 = scmp.ge.s32.totalorder %s444_s15, 1  ;;  %p148_p8 = scmp.lt.s32.totalorder %s444_s15, 3 }
   0xc   : > { %p149_p9 = pnand %p323_p7, %p148_p8 }
   0xd   : > { %p175_p10 = scmp.lt.s32.totalorder (!%p149_p9), %s489_s16, 1  ;;  %s328_s7 = sshll.u32 (!%p149_p9), %s489_s16, 3 }
   0xe   : > { %152 = sbr.rel (%p149_p9) target bundleno = 468 (0x1d4), region = 32  ;;  %s172_s8 = sand.u32 (!%p149_p9), 1, %s436_s13  }
   0xf   : > { %s324_s9 = sshll.u32 (!%p149_p9), %s172_s8, 3  ;;  %s402_s30 = scalar_lea.hbm (!%p149_p9), %s565_s3, 16 }
  0x10   : > { %s174_s17 = scalar_lea.vmem (!%p149_p9), [#allocation2], %s324_s9 }
  0x11   : > { %s246_s19 = sshll.u32 (!%p149_p9), %s174_s17, 4  ;;  %s247_s19 = int_to_ptr.vmem [resolvable:$true] %s246_s19 }
  0x13   : > { %v446_v0 = vmov 0   ;;  %s176_s24 = scalar_select %p175_p10, %s489_s16, 1  ;;  %vm185_vm0 = vcmask 261120   ;;  %v377_v9 = vld [vmem:[%s562_s0] ss:$0 sm:$0xff]  ;;  %v213_v14 = vlaneseq  ;;  %v215_v16 = vstv %s328_s7 }
  0x14   : > { %376 = vset.pattern.permute.xlu0 %v446_v0  ;;  %v447_v22 = vmov 0.0   ;;  %vm220_vm4 = vcmask 7168   ;;  %s244_s16 = scalar_lea.hbm %s565_s3, %s328_s7 }
  0x15   : > { %s325_s25 = sshll.u32 %s176_s24, 3  ;;  %v214_v15 = vshrl.u32 %v213_v14, 7  ;;  %s248_s20 = sshll.u32 %s244_s16, 4  ;;  %s249_s20 = int_to_ptr.hbm [resolvable:$true] %s248_s20 }
  0x16   : > { %s178_s28 = scalar_lea.vmem %s563_s1, %s325_s25  ;;  %s182_s4 = scalar_lea.vmem %s564_s2, %s325_s25 }
  0x17   : > { %v183_v1 = vld [vmem:[%s178_s28] sm:$0xff]  ;;  %v216_v19 = vadd.s32 %v215_v16, %v214_v15  ;;  %s234_s25 = scalar_lea.sflag [#allocation3], %s172_s8  ;;  %s396_s26 = sshra.s32 %s249_s20, 4  ;;  %s397_s26 = int_to_ptr.hbm [resolvable:$true] %s396_s26 }
  0x18   : > { %v186_v2 = vsel %vm185_vm0, %v183_v1, -inf  ;;  %v184_v3 = vld [vmem:[%s182_s4] sm:$0xff]  ;;  %s398_s27 = scalar_lea.hbm %s397_s26, 8  ;;  %p403_p0 = scmp.lt.s32.totalorder %s397_s26, %s565_s3 }
  0x19   : > { %187 = vmax.xlane.f32.xlu0 %v186_v2  ;;  %vm209_vm2 = vcmp.ge.s32.totalorder %v184_v3, 0  ;;  %vm217_vm3 = vcmp.lt.s32.totalorder %v216_v19, 16  ;;  %p399_p11 = scmp.ne.s32.totalorder %s397_s26, %s398_s27  ;;  %p404_p1 = scmp.lt.s32.totalorder %s402_s30, %s398_s27 }
  0x1a   : > { %v327_v23 = vsel %vm209_vm2, 1.0, %v447_v22 }
  0x1b   : > { %p400_p12 = pnand %p399_p11, %p506_p5  ;;  %p405_p2 = por %p404_p1, %p403_p0 }
  0x1d   : > { %p401_p13 = pneg %p400_p12 }
  0x1f   : > { %p406_p3 = pnand %p405_p2, %p401_p13 }
  0x2d   : > { %192 = vperm.xlu0 %376, %v184_v3  }
  0x8c   : > { %v188_v4 = vpop.xlane.xlu0 %187 }
  0x8d   : > { %v199_v5 = vsub.f32 %v183_v1, %v188_v4 }
  0x8f   : > { %v200_v6 = vmul.f32 1.442695, %v199_v5 }
  0x91   : > { %378 = vpow2.f32 %v200_v6 }
  0x97   : > { %v379_v7 = vpop.eup %378 }
  0x98   : > { %v202_v8 = vsel %vm185_vm0, %v379_v7, 0.0 }
  0x99   : > { %203 = vadd.xlane.f32.xlu1 %v202_v8 }
  0x9f   : > { %v193_v10 = vpop.permute.xlu0 %192 }
  0xa0   : > { %vm194_vm1 = vcmp.eq.s32.totalorder %v377_v9, %v193_v10 }
  0xa1   : > { %v195_v11 = vsel %vm194_vm1, %v183_v1, 0.0 }
  0xa2   : > { %v196_v12 = vsel %vm185_vm0, %v195_v11, 0.0 }
  0xa3   : > { %197 = vadd.xlane.f32.xlu1 %v196_v12 }
 0x10c   : > { %v204_v13 = vpop.xlane.xlu1 %203 }
 0x10d   : > { %380 = vlog2.f32 %v204_v13 }
 0x113   : > { %v381_v17 = vpop.eup %380 }
 0x114   : > { %v206_v18 = vmul.f32 0.6931472, %v381_v17 }
 0x116   : > { %v207_v20 = vadd.f32 %v206_v18, %v188_v4  ;;  %v198_v21 = vpop.xlane.xlu1 %197 }
 0x118   : > { %v208_v24 = vsub.f32 %v207_v20, %v198_v21 }
 0x11a   : > { %v218_v25 = vmul.f32 %v327_v23, %v208_v24 }
 0x11c   : > { %v219_v26 = vsel %vm217_vm3, %v218_v25, 0.0 }
 0x11d   : > { %v221_v27 = vsel %vm220_vm4, %v219_v26, 0.0 }
 0x11e   : > { %222 = vadd.xlane.f32.xlu2 %v221_v27 }
 0x191   : > { %v223_v28 = vpop.xlane.xlu2 %222 }
 0x192   : > { %v224_v29 = vrot.slane %v223_v28, 4 }
 0x194   : > { %v225_v30 = vadd.f32 %v224_v29, %v223_v28 }
 0x196   : > { %v226_v31 = vrot.slane %v225_v30, 2 }
 0x198   : > { %v227_v32 = vadd.f32 %v226_v31, %v225_v30 }
 0x19a   : > { %v228_v33 = vrot.slane %v227_v32, 1 }
 0x19c   : > { %v229_v34 = vadd.f32 %v228_v33, %v227_v32 }
 0x19e   : > { %333 = vpush %v229_v34 }
 0x1cf   : > { %s334_s24 = spop %333 }
 0x1d0   : > { %v231_v35 = vstv %s334_s24 }
 0x1d1   : > { %232 = vst [vmem:[%s174_s17] sm:$0xff] %v231_v35 }
 0x1d2   : > { %409 = shalt.err (!%p406_p3)
}
 0x1d3   : > { %335 = dma.vmem_to_hbm [thread:$0]  (%p506_p5), %s247_s19, 128, %s249_s20, %s234_s25  }
 0x1d4 PF: > { %p341_p4 = scmp.ge.s32.totalorder %s444_s15, 2  ;;  %s260_s6 = sand.u32 1, %s432_s12  }
 0x1d5   : > { %s261_s7 = scalar_lea.sflag [#allocation3], %s260_s6 }
 0x1d6   : > { %p338_p7 = pnand %p341_p4, %p510_p6 }
 0x1d8   : > { %p339_p8 = pneg %p338_p7 }
 0x1da   : > { %427 = dma.done.wait (%p339_p8), %s261_s7, 128  }
 0x1db   : > { %429 = vsyncadd (%p339_p8), %s261_s7, 4294967168  ;;  %p13_p9 = scmp.ge.s32.totalorder %s493_s18, 4   ;;  %s568_s12 = smov %s436_s13 }
 0x1dc   : > { %s569_s13 = smov %s440_s14  ;;  %s570_s14 = smov %s504_s21 }
 0x1dd   : > { %s571_s15 = smov %s493_s18  ;;  %15 = sbr.rel (!%p13_p9) target bundleno = 3 (0x3), region = 70 }
 0x1e2   :  { %267 = vsyncpa [#allocation3], 1 }
 0x1e3   :  { %269 = vsyncpa [#allocation3 + $0x1], 1 }

</bundles_post_ra>
